<compile_context>
chip_gen: v5e
topology: v5e:2x2
jax: 0.10.0
libtpu: 0.0.40
codegen_flags: <defaults>
</compile_context>

<pallas_src>
import functools
import math

import numpy as np
import jax
import jax.numpy as jnp
from jax import lax
from jax.experimental import pallas as pl
from jax.experimental.pallas import tpu as pltpu


def _round_up(x, m):
    return ((x + m - 1) // m) * m


# ------------------------------------------------------------------
# librosa.filters.mel equivalent (htk=False, norm="slaney") in numpy
# ------------------------------------------------------------------
def _hz_to_mel(f):
    f = np.asarray(f, dtype=np.float64)
    f_sp = 200.0 / 3
    mels = f / f_sp
    min_log_hz = 1000.0
    min_log_mel = min_log_hz / f_sp
    logstep = np.log(6.4) / 27.0
    return np.where(
        f >= min_log_hz,
        min_log_mel + np.log(np.maximum(f, min_log_hz) / min_log_hz) / logstep,
        mels,
    )


def _mel_to_hz(m):
    m = np.asarray(m, dtype=np.float64)
    f_sp = 200.0 / 3
    freqs = f_sp * m
    min_log_hz = 1000.0
    min_log_mel = min_log_hz / f_sp
    logstep = np.log(6.4) / 27.0
    return np.where(
        m >= min_log_mel,
        min_log_hz * np.exp(logstep * (m - min_log_mel)),
        freqs,
    )


def mel_filterbank(sr, n_fft, n_mels, fmin=0.0, fmax=None):
    if fmax is None:
        fmax = sr / 2.0
    n_freq = n_fft // 2 + 1
    fftfreqs = np.linspace(0.0, sr / 2.0, n_freq)
    mel_f = _mel_to_hz(np.linspace(_hz_to_mel(fmin), _hz_to_mel(fmax), n_mels + 2))
    fdiff = np.diff(mel_f)
    ramps = mel_f[:, None] - fftfreqs[None, :]
    weights = np.zeros((n_mels, n_freq), dtype=np.float64)
    for i in range(n_mels):
        lower = -ramps[i] / fdiff[i]
        upper = ramps[i + 2] / fdiff[i + 1]
        weights[i] = np.maximum(0.0, np.minimum(lower, upper))
    enorm = 2.0 / (mel_f[2: n_mels + 2] - mel_f[:n_mels])   # slaney norm
    weights *= enorm[:, None]
    return weights.astype(np.float64)


def hann_window(win_length):
    # torch.hann_window default: periodic=True
    n = np.arange(win_length, dtype=np.float64)
    return 0.5 - 0.5 * np.cos(2.0 * np.pi * n / win_length)


# ------------------------------------------------------------------
# Pallas kernel: fused windowed-DFT matmul -> magnitude -> mel -> log10(clamp)
# ------------------------------------------------------------------
def _audio2mel_kernel(frames_ref, trig_ref, melT_ref, out_ref, *,
                      n_freq_pad, clamp, inv_ln10):
    # (TM, n_fft) @ (n_fft, 2*n_freq_pad): real and imag parts in one MXU pass.
    ri = jnp.dot(frames_ref[...], trig_ref[...],
                 preferred_element_type=jnp.float32)
    re = ri[:, :n_freq_pad]                      # static lane-aligned slices
    im = ri[:, n_freq_pad:]
    mag = jnp.sqrt(re * re + im * im)            # f32 |STFT| (zero in padded lanes)
    mel = jnp.dot(mag.astype(melT_ref.dtype), melT_ref[...],
                  preferred_element_type=jnp.float32)   # (TM, n_mel_pad)
    out_ref[...] = jnp.log(jnp.maximum(mel, clamp)) * inv_ln10


class Audio2MelPallas:
    def __init__(self, hop_length, sampling_rate, n_mel_channels, win_length,
                 n_fft=None, mel_fmin=0, mel_fmax=None, clamp=1e-5,
                 compute_dtype=jnp.bfloat16, tile_m=512):
        n_fft = win_length if n_fft is None else n_fft
        assert win_length <= n_fft, "torch.stft requires win_length <= n_fft"
        assert tile_m % 8 == 0, "tile_m must be a sublane multiple (8)"

        self.n_fft = n_fft
        self.hop_length = hop_length
        self.win_length = win_length
        self.sampling_rate = sampling_rate
        self.n_mel_channels = n_mel_channels
        self.clamp = float(clamp)
        self.compute_dtype = compute_dtype
        self.tile_m = tile_m

        self.n_freq = n_fft // 2 + 1
        self.n_mel_pad = _round_up(n_mel_channels, 128)
        self.inv_ln10 = float(1.0 / np.log(10.0))

        # Mel basis first, so we can truncate the DFT basis at the highest
        # frequency bin that actually carries nonzero mel weight (bins above
        # mel_fmax never reach the output).
        mel = mel_filterbank(sampling_rate, n_fft, n_mel_channels,
                             fmin=mel_fmin, fmax=mel_fmax)      # (n_mel, n_freq)
        nz = np.nonzero(np.any(mel > 0.0, axis=0))[0]
        n_freq_eff = int(nz[-1]) + 1 if nz.size else self.n_freq
        self.n_freq_eff = n_freq_eff
        self.n_freq_pad = _round_up(n_freq_eff, 128)

        # Hann window, zero-padded & centered to n_fft (torch.stft semantics
        # when win_length < n_fft).
        win = np.zeros(n_fft, dtype=np.float64)
        off = (n_fft - win_length) // 2
        win[off:off + win_length] = hann_window(win_length)

        # Fused (window * one-sided DFT) basis: [cos | -sin], truncated at the
        # last useful bin and lane padded.
        n = np.arange(n_fft, dtype=np.float64)[:, None]
        k = np.arange(n_freq_eff, dtype=np.float64)[None, :]
        ang = 2.0 * np.pi * n * k / n_fft
        trig = np.zeros((n_fft, 2 * self.n_freq_pad), dtype=np.float64)
        trig[:, :n_freq_eff] = win[:, None] * np.cos(ang)
        trig[:, self.n_freq_pad:self.n_freq_pad + n_freq_eff] = \
            -win[:, None] * np.sin(ang)
        self.trig = jnp.asarray(trig, dtype=compute_dtype)     # (n_fft, 2*n_freq_pad)

        # Mel basis, transposed, truncated and zero-padded to
        # (n_freq_pad, n_mel_pad).
        melT = np.zeros((self.n_freq_pad, self.n_mel_pad), dtype=np.float64)
        melT[:n_freq_eff, :n_mel_channels] = mel[:, :n_freq_eff].T
        self.melT = jnp.asarray(melT, dtype=compute_dtype)

    # ----- framing glue (no materialized gather when n_fft % hop == 0) -----
    def _frame(self, padded, n_frames):
        BC = padded.shape[0]
        n_fft, hop = self.n_fft, self.hop_length
        if n_fft % hop == 0:
            K = n_fft // hop
            pieces = [
                lax.slice_in_dim(padded, k * hop, k * hop + n_frames * hop,
                                 axis=1).reshape(BC, n_frames, hop)
                for k in range(K)
            ]
            return jnp.concatenate(pieces, axis=-1)             # (BC, T_, n_fft)
        # TODO(synk): slow advanced-indexing gather fallback; replace with
        # in-kernel manual-DMA framing (pl.ANY + make_async_copy).
        idx = (jnp.arange(n_frames)[:, None] * hop
               + jnp.arange(n_fft)[None, :])
        return padded[:, idx]

    def __call__(self, audio):
        B, C, T = audio.shape
        BC = B * C
        audio2d = audio.reshape(BC, T).astype(jnp.float32)

        # torch.stft(center=True): reflect-pad n_fft//2 on both sides.
        pad = self.n_fft // 2
        padded = jnp.pad(audio2d, ((0, 0), (pad, pad)), mode="reflect")
        T_pad = T + 2 * pad
        n_frames = 1 + (T_pad - self.n_fft) // self.hop_length
        M = BC * n_frames

        # Adaptive tile: keep >= ~4 grid steps (pipelining + 2-TC sharding on
        # v7x) for short clips, never below the sublane minimum of 8.
        TM = min(self.tile_m, _round_up(max(M, 8), 8))
        while TM > 8 and pl.cdiv(M, TM) < 4:
            half = TM // 2
            TM = max(8, half - (half % 8))

        # Pad the 1-D signal (NOT the frames array) so M is a multiple of TM:
        # costs a few hops of zeros per row instead of a full HBM re-copy of
        # the (M, n_fft) frames tensor.
        g = math.gcd(BC, TM)
        frame_step = TM // g
        n_frames_pad = _round_up(n_frames, frame_step)
        M_pad = BC * n_frames_pad
        T_req = (n_frames_pad - 1) * self.hop_length + self.n_fft
        extra = max(0, T_req - T_pad)

        # Framing glue runs in compute_dtype end-to-end (halves glue HBM bytes).
        padded = padded.astype(self.compute_dtype)
        if extra:
            padded = jnp.pad(padded, ((0, 0), (0, extra)))

        frames = self._frame(padded, n_frames_pad)              # (BC, T_pad_frames, n_fft)
        frames = frames.reshape(M_pad, self.n_fft)

        n_fft = self.n_fft
        n_freq_pad = self.n_freq_pad
        n_mel_pad = self.n_mel_pad
        itemsize = jnp.dtype(self.compute_dtype).itemsize

        # Explicit scoped-VMEM budget: frames tile x2 (double-buffered),
        # resident trig/melT x1 (single-buffered), out tile x2, plus f32
        # intermediates (~3*TM*n_freq_pad + TM*n_mel_pad).
        vmem_need = (2 * TM * n_fft * itemsize
                     + n_fft * 2 * n_freq_pad * itemsize
                     + n_freq_pad * n_mel_pad * itemsize
                     + 2 * TM * n_mel_pad * 4
                     + TM * (3 * n_freq_pad + n_mel_pad) * 4)
        vmem_limit = int(min(max(2 * vmem_need, 32 << 20), 64 << 20))

        cost = pl.CostEstimate(
            flops=int(2 * M_pad * n_fft * (2 * n_freq_pad)
                      + 2 * M_pad * n_freq_pad * n_mel_pad),
            transcendentals=int(M_pad * n_freq_pad + M_pad * n_mel_pad),
            bytes_accessed=int(M_pad * n_fft * itemsize
                               + n_fft * 2 * n_freq_pad * itemsize
                               + n_freq_pad * n_mel_pad * itemsize
                               + M_pad * n_mel_pad * 4),
        )

        out = pl.pallas_call(
            functools.partial(_audio2mel_kernel,
                              n_freq_pad=n_freq_pad,
                              clamp=self.clamp,
                              inv_ln10=self.inv_ln10),
            out_shape=jax.ShapeDtypeStruct((M_pad, n_mel_pad), jnp.float32),
            grid=(M_pad // TM,),
            in_specs=[
                # streamed frames tile (double-buffered by default)
                pl.BlockSpec((TM, n_fft), lambda i: (i, 0)),
                # resident bases: constant index_map -> single-buffer them
                pl.BlockSpec((n_fft, 2 * n_freq_pad), lambda i: (0, 0),
                             pipeline_mode=pl.Buffered(1)),
                pl.BlockSpec((n_freq_pad, n_mel_pad), lambda i: (0, 0),
                             pipeline_mode=pl.Buffered(1)),
            ],
            out_specs=pl.BlockSpec((TM, n_mel_pad), lambda i: (i, 0)),
            compiler_params=pltpu.CompilerParams(
                dimension_semantics=("parallel",),
                vmem_limit_bytes=vmem_limit),
            cost_estimate=cost,
        )(frames, self.trig, self.melT)

        # Drop padded frames / lanes, then reproduce torch's
        # reshape(B,C,n_mel,T_) -> permute(0,3,1,2) -> squeeze(2).
        out = out.reshape(BC, n_frames_pad, n_mel_pad)
        out = out[:, :n_frames, :self.n_mel_channels]
        out = out.reshape(B, C, n_frames, self.n_mel_channels)
        out = jnp.transpose(out, (0, 2, 1, 3))                  # (B, T_, C, n_mel)
        if C == 1:                                              # squeeze only size-1 dim
            out = jnp.squeeze(out, axis=2)
        return out


if __name__ == "__main__":
    # small, module-consistent shapes
    B, C, T = 2, 1, 256
    hop_length, win_length, n_mel = 16, 64, 16
    sampling_rate = 16000

    key = jax.random.PRNGKey(0)
    audio = jax.random.normal(key, (B, C, T), dtype=jnp.float32)

    a2m = Audio2MelPallas(hop_length=hop_length,
                          sampling_rate=sampling_rate,
                          n_mel_channels=n_mel,
                          win_length=win_length)
    log_mel = a2m(audio)
    jax.block_until_ready(log_mel)
    assert log_mel.shape == (B, 1 + T // hop_length, n_mel), log_mel.shape
    assert bool(jnp.all(jnp.isfinite(log_mel)))
    print("KERNEL_OK")
</pallas_src>

<mosaic_0001>
module attributes {stable_mosaic.version = 11 : i64} {
  func.func @_audio2mel_kernel(%arg0: i32, %arg1: memref<8x64xbf16, #tpu.memory_space<vmem>>, %arg2: memref<64x256xbf16, #tpu.memory_space<vmem>>, %arg3: memref<128x128xbf16, #tpu.memory_space<vmem>>, %arg4: memref<8x128xf32, #tpu.memory_space<vmem>>) attributes {dimension_semantics = [#tpu.dimension_semantics<parallel>], iteration_bounds = array<i64: 5>, scalar_prefetch = 0 : i64, scratch_operands = 0 : i64, tpu.core_type = #tpu.core_type<tc>, window_params = [{transform_indices = @transform_0, window_bounds = array<i64: 8, 64>}, {pipeline_mode = #tpu.pipeline_mode<synchronous>, transform_indices = @transform_1, window_bounds = array<i64: 64, 256>}, {pipeline_mode = #tpu.pipeline_mode<synchronous>, transform_indices = @transform_2, window_bounds = array<i64: 128, 128>}, {transform_indices = @transform_3, window_bounds = array<i64: 8, 128>}]} {
    %c0 = arith.constant 0 : index
    %c0_0 = arith.constant 0 : index
    %0 = vector.load %arg1[%c0, %c0_0] : memref<8x64xbf16, #tpu.memory_space<vmem>>, vector<8x64xbf16>
    %c0_1 = arith.constant 0 : index
    %c0_2 = arith.constant 0 : index
    %1 = vector.load %arg2[%c0_1, %c0_2] : memref<64x256xbf16, #tpu.memory_space<vmem>>, vector<64x256xbf16>
    %cst = arith.constant dense<0.000000e+00> : vector<8x256xf32>
    %2 = tpu.matmul %0, %1, %cst {dimension_numbers = #tpu.dot_dimension_numbers<[1], [0], [0], [1], [0, 0, 1, 1], [], []>} : vector<8x64xbf16>, vector<64x256xbf16>, vector<8x256xf32> -> vector<8x256xf32>
    %3 = vector.extract_strided_slice %2 {offsets = [0, 0], sizes = [8, 128], strides = [1, 1]} : vector<8x256xf32> to vector<8x128xf32>
    %4 = vector.extract_strided_slice %2 {offsets = [0, 128], sizes = [8, 128], strides = [1, 1]} : vector<8x256xf32> to vector<8x128xf32>
    %5 = arith.mulf %3, %3 : vector<8x128xf32>
    %6 = arith.mulf %4, %4 : vector<8x128xf32>
    %7 = arith.addf %5, %6 : vector<8x128xf32>
    %8 = math.sqrt %7 : vector<8x128xf32>
    %9 = arith.truncf %8 : vector<8x128xf32> to vector<8x128xbf16>
    %c0_3 = arith.constant 0 : index
    %c0_4 = arith.constant 0 : index
    %10 = vector.load %arg3[%c0_3, %c0_4] : memref<128x128xbf16, #tpu.memory_space<vmem>>, vector<128x128xbf16>
    %cst_5 = arith.constant dense<0.000000e+00> : vector<8x128xf32>
    %11 = tpu.matmul %9, %10, %cst_5 {dimension_numbers = #tpu.dot_dimension_numbers<[1], [0], [0], [1], [0, 0, 1, 1], [], []>} : vector<8x128xbf16>, vector<128x128xbf16>, vector<8x128xf32> -> vector<8x128xf32>
    %cst_6 = arith.constant 9.99999974E-6 : f32
    %12 = vector.broadcast %cst_6 : f32 to vector<8x128xf32>
    %13 = arith.maximumf %11, %12 : vector<8x128xf32>
    %14 = math.log %13 : vector<8x128xf32>
    %cst_7 = arith.constant 0.434294492 : f32
    %15 = vector.broadcast %cst_7 : f32 to vector<8x128xf32>
    %16 = arith.mulf %14, %15 : vector<8x128xf32>
    %c0_8 = arith.constant 0 : index
    %c0_9 = arith.constant 0 : index
    %17 = vector.load %arg4[%c0_8, %c0_9] : memref<8x128xf32, #tpu.memory_space<vmem>>, vector<8x128xf32>
    tpu.vector_store %arg4[%c0_8, %c0_9], %16 {strides = array<i32>} : memref<8x128xf32, #tpu.memory_space<vmem>>, vector<8x128xf32>,
    return
  }
  func.func @transform_0(%arg0: i32) -> (i32, i32) {
    %c0_i32 = arith.constant 0 : i32
    %c0_i32_0 = arith.constant 0 : i32
    return %arg0, %c0_i32 : i32, i32
  }
  func.func @transform_1(%arg0: i32) -> (i32, i32) {
    %c0_i32 = arith.constant 0 : i32
    %c0_i32_0 = arith.constant 0 : i32
    %c0_i32_1 = arith.constant 0 : i32
    return %c0_i32, %c0_i32_0 : i32, i32
  }
  func.func @transform_2(%arg0: i32) -> (i32, i32) {
    %c0_i32 = arith.constant 0 : i32
    %c0_i32_0 = arith.constant 0 : i32
    %c0_i32_1 = arith.constant 0 : i32
    return %c0_i32, %c0_i32_0 : i32, i32
  }
  func.func @transform_3(%arg0: i32) -> (i32, i32) {
    %c0_i32 = arith.constant 0 : i32
    %c0_i32_0 = arith.constant 0 : i32
    return %arg0, %c0_i32 : i32, i32
  }
}

</mosaic_0001>

<bundles_post_ra>
// kernel: tpu_custom_call.1
= control target key start
LH: loop header
LB: loop body
LE: loop exit
PB: predicated region body
PF: predicated region fallthrough
CT: control target
= control target key end

     0   :  { %8 = vsyncpa [#allocation3], 0  ;;  %s1012_s0 = inlined_call_operand.hbm [shape: bf16[40,64], index: 0, kind: input, shape index: {}]   ;;  %s1013_s1 = inlined_call_operand.hbm [shape: bf16[64,256], index: 1, kind: input, shape index: {}]   ;;  %s1014_s2 = inlined_call_operand.hbm [shape: bf16[128,128], index: 2, kind: input, shape index: {}]   ;;  %s1015_s3 = inlined_call_operand.hbm [shape: f32[40,128], index: 3, kind: output, shape index: {}]  }
   0x1   :  { %10 = vsyncpa [#allocation3 + $0x1], 0 }
   0x2   :  { %11 = vsyncpa [#allocation6], 0 }
   0x3   :  { %12 = vsyncpa [#allocation4], 0 }
   0x4   :  { %14 = vsyncpa [#allocation4 + $0x1], 0  ;;  %s865_s12 = smov 0   ;;  %s867_s13 = smov 0  }
   0x5   :  { %s869_s14 = smov 0   ;;  %s871_s15 = smov 0  }
   0x6 LB: > { %s130_s18 = sshll.u32 %s1013_s1, 4  ;;  %s889_s19 = sadd.s32 4294967295, %s837_s15   ;;  %s837_s15 = sphi %s871_s15, %s1025_s15   ;;  %s833_s14 = sphi %s869_s14, %s1024_s14   ;;  %s829_s13 = sphi %s867_s13, %s1023_s13   ;;  %s825_s12 = sphi %s865_s12, %s1022_s12   ;;  %s131_s18 = int_to_ptr.hbm [resolvable:$true] %s130_s18 }
   0x7   : > { %p505_p0 = scmp.ge.s32.totalorder %s837_s15, 1  ;;  %p41_p1 = scmp.eq.s32.totalorder %s889_s19, 0 }
   0x8   : > { %p119_p2 = scmp.lt.s32.totalorder %s837_s15, 6  ;;  %s839_s21 = smov [#allocation5]  }
   0x9   : > { %s132_s22 = sshll.u32 %s839_s21, 4  ;;  %s144_s25 = sshll.u32 %s1014_s2, 4  ;;  %s133_s22 = int_to_ptr.vmem [resolvable:$true] %s132_s22  ;;  %s145_s25 = int_to_ptr.hbm [resolvable:$true] %s144_s25 }
   0xa   : > { %p894_p3 = pnand %p505_p0, %p119_p2  ;;  %s840_s26 = smov [#allocation7]  }
   0xb   : > { %s146_s27 = sshll.u32 %s840_s26, 4  ;;  %s841_s28 = smov 128   ;;  %s147_s27 = int_to_ptr.vmem [resolvable:$true] %s146_s27 }
   0xc   : > { %p614_p4 = pneg %p894_p3  ;;  %s842_s29 = smov 8  }
   0xd   : > { %s843_s30 = smov 64   ;;  %s844_s4 = smov 4  }
   0xe   : > { %p615_p5 = pnand %p614_p4, %p41_p1  ;;  %s504_s5 = sadd.s32 4294967294, %s837_s15  }
   0xf   : > { %s907_s6 = sadd.s32 1, %s837_s15   ;;  %s27_s8 = sadd.s32 1, %s833_s14 }
  0x10   : > { %617 = dma.hbm_to_vmem [thread:$0]  (!%p615_p5), %s131_s18, 1024, %s133_s22, [#allocation6], %s841_s28, %s841_s28, %s842_s29  }
  0x11   : > { %620 = dma.hbm_to_vmem [thread:$0]  (!%p615_p5), %s145_s25, 1024, %s147_s27, [#allocation6], %s843_s30, %s843_s30, %s844_s4  }
  0x12   : > { %s24_s7 = ssub.s32 %s837_s15, %s907_s6  ;;  %p34_p7 = scmp.ne.s32.totalorder %s833_s14, %s829_s13 }
  0x13   : > { %p25_p6 = scmp.eq.s32.totalorder %s24_s7, 0  ;;  %p35_p8 = scmp.eq.s32.totalorder %s837_s15, 0 }
  0x14   : > { %p40_p9 = scmp.ne.s32.totalorder %s829_s13, %s825_s12  ;;  %p106_p12 = scmp.eq.s32.totalorder %s889_s19, 4 }
  0x15   : > { %s918_s9 = scalar_select %p25_p6, %s833_s14, %s27_s8  }
  0x16   : > { %p920_p10 = por %p35_p8, %p34_p7  ;;  %p926_p11 = por %p41_p1, %p40_p9 }
  0x17   : > { %p112_p13 = scmp.eq.s32.totalorder %s504_s5, 4  ;;  %p631_p0 = scmp.lt.s32.totalorder %s837_s15, 5 }
  0x18   : > { %s160_s16 = sand.u32 1, %s833_s14   ;;  %p933_p2 = por %p106_p12, %p34_p7 }
  0x19   : > { %p937_p4 = por %p112_p13, %p40_p9  ;;  %s509_s21 = sshll.u32 %s160_s16, 2 }
  0x1a   : > { %s510_s22 = sshll.u32 %s837_s15, 2  ;;  %s164_s26 = scalar_lea.vmem [#allocation2], %s509_s21 }
  0x1b   : > { %s168_s25 = scalar_lea.hbm %s1012_s0, %s510_s22  ;;  %s172_s27 = sshll.u32 %s164_s26, 4  ;;  %s173_s27 = int_to_ptr.vmem [resolvable:$true] %s172_s27 }
  0x1c   : > { %s170_s28 = sshll.u32 %s168_s25, 4  ;;  %p947_p5 = pnand %p631_p0, %p920_p10  ;;  %s171_s28 = int_to_ptr.hbm [resolvable:$true] %s170_s28 }
  0x1d   : > { %s161_s30 = scalar_lea.sflag [#allocation3], %s160_s16  ;;  %s737_s4 = sshra.s32 %s171_s28, 4  ;;  %s738_s4 = int_to_ptr.hbm [resolvable:$true] %s737_s4 }
  0x1e   : > { %s739_s5 = scalar_lea.hbm %s738_s4, 4  ;;  %p741_p7 = pneg %p947_p5 }
  0x1f   : > { %p740_p6 = scmp.ne.s32.totalorder %s738_s4, %s739_s5  ;;  %s744_s21 = scalar_lea.hbm %s1012_s0, 20 }
  0x20   : > { %p745_p10 = scmp.lt.s32.totalorder %s738_s4, %s1012_s0  ;;  %p746_p12 = scmp.lt.s32.totalorder %s744_s21, %s739_s5 }
  0x21   : > { %p742_p8 = pnand %p741_p7, %p740_p6 }
  0x22   : > { %p747_p13 = por %p746_p12, %p745_p10 }
  0x23   : > { %p743_p9 = pneg %p742_p8 }
  0x25   : > { %p748_p0 = pnand %p747_p13, %p743_p9 }
  0x27   : > { %751 = shalt.err (!%p748_p0)
}
  0x28   : > { %624 = dma.hbm_to_vmem [thread:$0]  (!%p947_p5), %s171_s28, 64, %s173_s27, %s161_s30  }
  0x29   : > { %181 = sbr.rel (%p894_p3) target bundleno = 369 (0x171), region = 32  ;;  %s964_s16 = sand.u32 (!%p894_p3), 1, %s829_s13  }
  0x2a   : > { %s512_s23 = sshll.u32 (!%p894_p3), %s964_s16, 2  ;;  %s184_s24 = scalar_lea.sflag (!%p894_p3), [#allocation3], %s964_s16 }
  0x2b   : > { %s968_s25 = scalar_lea.vmem (!%p894_p3), [#allocation2], %s512_s23 }
  0x2e   : > { %812 = dma.done.wait (%p926_p11), %s184_s24, 64  }
  0x2f   : > { %814 = vsyncadd (%p926_p11), %s184_s24, 4294967232 }
  0x30   : > { %816 = dma.done.wait (%p41_p1), [#allocation6], 2048  }
  0x31   : > { %818 = vsyncadd (%p41_p1), [#allocation6], 4294965248  ;;  %v542_v0 = vld [vmem:[#allocation5 + $0x30] sm:$0xf]  ;;  %v593_v1 = vld [vmem:[#allocation5 + $0x34] sm:$0xf0] }
  0x32   : > { %v592_v2 = vld [vmem:[#allocation5 + $0x34] sm:$0xf]  ;;  %v543_v3 = vor.u32 %v593_v1, %v542_v0  ;;  %v544_v4 = vld [vmem:[#allocation5 + $0x38] sm:$0xf0]  ;;  %v534_v5 = vld [vmem:[#allocation5 + $0x20] sm:$0xf] }
  0x33   : > { %v591_v6 = vld [vmem:[#allocation5 + $0x24] sm:$0xf0]  ;;  %v547_v7 = vor.u32 %v592_v2, %v544_v4  ;;  %v590_v8 = vld [vmem:[#allocation5 + $0x24] sm:$0xf]  ;;  %v536_v9 = vld [vmem:[#allocation5 + $0x28] sm:$0xf0] }
  0x34   : > { %279 = vmatpush.bf16.msra.mxu0 %v543_v3  ;;  %v535_v10 = vor.u32 %v591_v6, %v534_v5  ;;  %v539_v11 = vor.u32 %v590_v8, %v536_v9  ;;  %v526_v12 = vld [vmem:[#allocation5 + $0x10] sm:$0xf]  ;;  %v589_v13 = vld [vmem:[#allocation5 + $0x14] sm:$0xf0]  ;;  %v588_v14 = vld [vmem:[#allocation5 + $0x14] sm:$0xf] }
  0x35   : > { %292 = vmatpush.bf16.msra.mxu1 %v547_v7  ;;  %v528_v15 = vld [vmem:[#allocation5 + $0x18] sm:$0xf0]  ;;  %v527_v17 = vor.u32 %v589_v13, %v526_v12  ;;  %v518_v19 = vld [vmem:[#allocation5] sm:$0xf]  ;;  %v587_v20 = vld [vmem:[#allocation5 + $0x4] sm:$0xf0] }
  0x36   : > { %v601_v16 = vld [vmem:[#allocation7 + $0x38] sm:$0xff]  ;;  %v531_v18 = vor.u32 %v588_v14, %v528_v15  ;;  %v586_v21 = vld [vmem:[#allocation5 + $0x4] sm:$0xf]  ;;  %v520_v22 = vld [vmem:[#allocation5 + $0x8] sm:$0xf0]  ;;  %v519_v23 = vor.u32 %v587_v20, %v518_v19  ;;  %vm271_vm0 = vcmask 523264  }
  0x37   : > { %381 = vmatpush.bf16.msra.mxu2 %v601_v16  ;;  %v523_v24 = vor.u32 %v586_v21, %v520_v22  ;;  %v222_v25 = vld [vmem:[%s968_s25] sm:$0xf]  ;;  %v600_v26 = vld [vmem:[#allocation7 + $0x30] sm:$0xff]  ;;  %v599_v27 = vld [vmem:[#allocation7 + $0x28] sm:$0xff]  ;;  %s515_s20 = sshll.u32 %s964_s16, 3  ;;  %s583_s11 = sshll.u32 %s889_s19, 3 }
  0x38   : > { %280 = vmatpush.bf16.msra.mxu0 %v535_v10  ;;  %v598_v28 = vld [vmem:[#allocation7 + $0x20] sm:$0xff]  ;;  %v597_v29 = vld [vmem:[#allocation7 + $0x18] sm:$0xff]  ;;  %v596_v30 = vld [vmem:[#allocation7 + $0x10] sm:$0xff]  ;;  %s410_s28 = scalar_lea.hbm %s1015_s3, %s583_s11  ;;  %s220_s29 = scalar_lea.vmem [#allocation8], %s515_s20 }
  0x39   : > { %293 = vmatpush.bf16.msra.mxu1 %v539_v11  ;;  %v595_v31 = vld [vmem:[#allocation7 + $0x8] sm:$0xff]  ;;  %v594_v32 = vld [vmem:[#allocation7] sm:$0xff]  ;;  %s412_s30 = sshll.u32 %s220_s29, 4  ;;  %s414_s4 = sshll.u32 %s410_s28, 4  ;;  %s413_s30 = int_to_ptr.vmem [resolvable:$true] %s412_s30  ;;  %s415_s4 = int_to_ptr.hbm [resolvable:$true] %s414_s4 }
  0x3a   : > { %s400_s5 = scalar_lea.sflag [#allocation4], %s964_s16  ;;  %s781_s7 = sshra.s32 %s415_s4, 4  ;;  %s782_s7 = int_to_ptr.hbm [resolvable:$true] %s781_s7 }
  0x3b   : > { %382 = vmatpush.bf16.msra.mxu2 %v600_v26  ;;  %s783_s8 = scalar_lea.hbm %s782_s7, 8  ;;  %s787_s22 = scalar_lea.hbm %s1015_s3, 40 }
  0x3c   : > { %281 = vmatpush.bf16.msra.mxu0 %v527_v17  ;;  %p784_p1 = scmp.ne.s32.totalorder %s782_s7, %s783_s8  ;;  %p788_p5 = scmp.lt.s32.totalorder %s782_s7, %s1015_s3 }
  0x3d   : > { %294 = vmatpush.bf16.msra.mxu1 %v531_v18  ;;  %p789_p6 = scmp.lt.s32.totalorder %s787_s22, %s783_s8 }
  0x3e   : > { %p785_p3 = pnand %p784_p1, %p933_p2 }
  0x3f   : > { %383 = vmatpush.bf16.msra.mxu2 %v599_v27  ;;  %p790_p7 = por %p789_p6, %p788_p5 }
  0x40   : > { %282 = vmatpush.bf16.msra.mxu0 %v519_v23  ;;  %p786_p11 = pneg %p785_p3 }
  0x41   : > { %295 = vmatpush.bf16.msra.mxu1 %v523_v24 }
  0x42   : > { %p791_p8 = pnand %p790_p7, %p786_p11 }
  0x43   : > { %548 = vmatmul.msk.bf16.vlgmr.msra.gmra.mxu0 %vm271_vm0, %v222_v25  ;;  %384 = vmatpush.bf16.msra.mxu2 %v598_v28 }
  0x44   : > { %549 = vmatmul.msk.bf16.vlgmr.msra.gmra.mxu1 %vm271_vm0, %v222_v25 }
  0x47   : > { %385 = vmatpush.bf16.msra.mxu2 %v597_v29 }
  0x4b   : > { %386 = vmatpush.bf16.msra.mxu2 %v596_v30 }
  0x4f   : > { %387 = vmatpush.bf16.msra.mxu2 %v595_v31 }
  0x53   : > { %388 = vmatpush.bf16.msra.mxu2 %v594_v32 }
  0xc0   : > { %v284_v33 = vpop.f32.mrf.mxu0 }
  0xc1   : > { %v301_v34 = vmul.f32 %v284_v33, %v284_v33  ;;  %v297_v35 = vpop.f32.mrf.mxu1 }
  0xc2   : > { %v302_v36 = vmul.f32 %v297_v35, %v297_v35 }
  0xc4   : > { %v303_v37 = vadd.f32 %v302_v36, %v301_v34 }
  0xc6   : > { %673 = vrsqrt.f32 %v303_v37  ;;  %vm311_vm1 = vcmp.eq.f32.partialorder %v303_v37, inf  ;;  %v314_v47 = vand.u32 2147483648, %v303_v37  ;;  %vm313_vm2 = vcmp.eq.f32.partialorder %v303_v37, 0.0 }
  0xc8   : > { %v286_v38 = vpop.f32.mrf.mxu0 }
  0xc9   : > { %v299_v39 = vpop.f32.mrf.mxu1 }
  0xcc   : > { %v674_v40 = vpop.eup %673 }
  0xcd   : > { %v305_v41 = vmul.f32 %v674_v40, %v303_v37 }
  0xcf   : > { %v306_v42 = vmul.f32 %v674_v40, %v305_v41 }
  0xd1   : > { %v307_v43 = vmul.f32 0.5, %v306_v42 }
  0xd3   : > { %v308_v44 = vsub.f32 1.5, %v307_v43 }
  0xd5   : > { %v309_v45 = vmul.f32 %v674_v40, %v308_v44 }
  0xd7   : > { %v310_v46 = vmul.f32 %v309_v45, %v303_v37 }
  0xd9   : > { %v312_v48 = vsel %vm311_vm1, %v303_v37, %v310_v46 }
  0xda   : > { %v315_v49 = vsel %vm313_vm2, %v314_v47, %v312_v48 }
  0xdb   : > { %v316_v50 = vpack.c.bf16 %v315_v49, %v315_v49 }
  0xdd   : > { %389 = vmatmul.bf16.vlgmr.msra.gmra.mxu2 %v316_v50 }
 0x160   : > { %v390_v51 = vpop.f32.mrf.mxu2 }
 0x161   : > { %v394_v52 = vmax.f32 %v390_v51, 1e-05 }
 0x163   : > { %675 = vlog2.f32 %v394_v52 }
 0x168   : > { %v392_v53 = vpop.f32.mrf.mxu2 }
 0x169   : > { %v676_v54 = vpop.eup %675 }
 0x16a   : > { %v396_v55 = vmul.f32 0.6931472, %v676_v54 }
 0x16c   : > { %v397_v56 = vmul.f32 0.4342945, %v396_v55 }
 0x16e   : > { %398 = vst [vmem:[%s220_s29] sm:$0xff] %v397_v56 }
 0x16f   : > { %794 = shalt.err (!%p791_p8)
}
 0x170   : > { %612 = dma.vmem_to_hbm [thread:$0]  (%p933_p2), %s413_s30, 128, %s415_s4, %s400_s5  }
 0x171 PF: > { %p634_p9 = scmp.ge.s32.totalorder %s837_s15, 2  ;;  %s426_s16 = sand.u32 1, %s825_s12  }
 0x172   : > { %s427_s24 = scalar_lea.sflag [#allocation4], %s426_s16 }
 0x173   : > { %p626_p10 = pnand %p634_p9, %p937_p4 }
 0x175   : > { %p627_p12 = pneg %p626_p10 }
 0x177   : > { %820 = dma.done.wait (%p627_p12), %s427_s24, 128  }
 0x178   : > { %822 = vsyncadd (%p627_p12), %s427_s24, 4294967168  ;;  %p17_p13 = scmp.ge.s32.totalorder %s907_s6, 7   ;;  %s1022_s12 = smov %s829_s13 }
 0x179   : > { %s1023_s13 = smov %s833_s14  ;;  %s1024_s14 = smov %s918_s9 }
 0x17a   : > { %s1025_s15 = smov %s907_s6  ;;  %19 = sbr.rel (!%p17_p13) target bundleno = 6 (0x6), region = 85 }
 0x17f   :  { %433 = vsyncpa [#allocation3], 1 }
 0x180   :  { %435 = vsyncpa [#allocation3 + $0x1], 1 }
 0x181   :  { %436 = vsyncpa [#allocation6], 1 }
 0x182   :  { %437 = vsyncpa [#allocation4], 1 }
 0x183   :  { %439 = vsyncpa [#allocation4 + $0x1], 1 }

</bundles_post_ra>
